<compile_context>
chip_gen: v5e
topology: v5e:2x2
jax: 0.10.0
libtpu: 0.0.40
codegen_flags: <defaults>
</compile_context>

<pallas_src>
import jax
import jax.numpy as jnp
from jax.experimental import pallas as pl
from jax.experimental.pallas import tpu as pltpu

NEG_SLOPE = 0.01   # nn.LeakyReLU default
BN_EPS = 1e-5      # nn.BatchNorm2d default


def _leaky(v):
    return jnp.where(v >= 0, v, v * NEG_SLOPE)


# ----------------------------- Pallas kernel ---------------------------------
def aspp_kernel(x_ref, w_all_ref, map_s_ref, map_b_ref, wred_ref,
                red_s_ref, red_b_ref, g_ref, out_ref):
    # x_ref block: (1, K_total, H*W)   -- shifted-patch-packed input, one image
    # w_all_ref  : (4*HID, K_total)    -- all four map_convs fused (K and N)
    # map_s/b    : (4*HID, 1)          -- folded map_bn affine
    # wred_ref   : (COUT, 4*HID)       -- red_conv
    # red_s/b    : (COUT, 1)           -- folded red_bn affine
    # g_ref block: (1, COUT, 1)        -- precomputed global-pool branch bias
    # out_ref    : (1, COUT, H*W)      -- flattened-NCHW output (lane-dense)
    xT = x_ref[0]                                             # (K_total, H*W)

    # All four map_convs + concat as one matmul (lane-dense N = H*W).
    h = jnp.dot(w_all_ref[...], xT,
                preferred_element_type=jnp.float32)           # (4*HID, H*W)
    a = _leaky(h * map_s_ref[...] + map_b_ref[...])

    # red_conv as one matmul, output already channel-major (NCHW-flat).
    out = jnp.dot(wred_ref[...], a,
                  preferred_element_type=jnp.float32)         # (COUT, H*W)
    out = out + g_ref[0]                                      # pool-branch bias
    out = _leaky(out * red_s_ref[...] + red_b_ref[...])
    out_ref[0] = out.astype(out_ref.dtype)


# --------------------------- host-side packing --------------------------------
def build_shift_table(dilations, H, W):
    """Unique (dy, dx) shifts whose window overlaps the image + per-branch taps."""
    shifts = [(0, 0)]
    shift_idx = {(0, 0): 0}
    tap_map = []
    for d in dilations:
        taps = []
        for ky in range(3):
            for kx in range(3):
                dy, dx = (ky - 1) * d, (kx - 1) * d
                if abs(dy) >= H or abs(dx) >= W:
                    continue          # tap reads only zero padding -> skip
                key = (dy, dx)
                if key not in shift_idx:
                    shift_idx[key] = len(shifts)
                    shifts.append(key)
                taps.append(((ky, kx), shift_idx[key]))
        tap_map.append(taps)
    return shifts, tap_map


def pack_input(x_nchw, shifts, H, W):
    """(B, C, H, W) -> (B, n_shifts*C, H*W): shifted zero-padded views stacked on C."""
    B = x_nchw.shape[0]
    p = max(max(abs(dy), abs(dx)) for dy, dx in shifts)
    xp = jnp.pad(x_nchw, ((0, 0), (0, 0), (p, p), (p, p))) if p > 0 else x_nchw
    views = [xp[:, :, p + dy:p + dy + H, p + dx:p + dx + W] for dy, dx in shifts]
    return jnp.concatenate(views, axis=1).reshape(B, -1, H * W)


def _bn_affine(gamma, beta, mean, var):
    scale = gamma / jnp.sqrt(var + BN_EPS)
    return scale, beta - mean * scale


def to_kernel_params(tp, C_in, HID, COUT, dilations, H, W):
    shifts, tap_map = build_shift_table(dilations, H, W)
    K_total = len(shifts) * C_in

    w_all = jnp.zeros((K_total, 4 * HID), jnp.float32)
    # branch 0: 1x1 conv -> center shift (index 0)
    w_all = w_all.at[0:C_in, 0:HID].set(tp["w0"][:, :, 0, 0].T)
    # branches 1..3: surviving taps of the dilated 3x3 convs
    for bi, name in enumerate(("w1", "w2", "w3")):
        wk = tp[name]                                   # (HID, C_in, 3, 3)
        c0 = (bi + 1) * HID
        for (ky, kx), s in tap_map[bi]:
            rows = slice(s * C_in, (s + 1) * C_in)
            w_all = w_all.at[rows, c0:c0 + HID].set(wk[:, :, ky, kx].T)

    map_s, map_b = _bn_affine(tp["map_gamma"], tp["map_beta"],
                              tp["map_mean"], tp["map_var"])
    g_s, g_b = _bn_affine(tp["g_gamma"], tp["g_beta"], tp["g_mean"], tp["g_var"])
    red_s, red_b = _bn_affine(tp["red_gamma"], tp["red_beta"],
                              tp["red_mean"], tp["red_var"])

    return dict(
        shifts=shifts,
        w_allT=w_all.T,                                 # (4*HID, K_total)
        map_s=map_s.reshape(4 * HID, 1), map_b=map_b.reshape(4 * HID, 1),
        wredT=tp["wred"][:, :, 0, 0],                   # (COUT, 4*HID)
        red_s=red_s.reshape(COUT, 1), red_b=red_b.reshape(COUT, 1),
        wg=tp["wg"][:, :, 0, 0].T,                      # (C_in, HID)
        g_s=g_s, g_b=g_b,
        wpool=tp["wpool"][:, :, 0, 0].T,                # (HID, COUT)
    )


# ------------------------------- forward --------------------------------------
def aspp_forward(x_nchw, kp):
    B, C_in, H, W = x_nchw.shape
    HID4, K_total = kp["w_allT"].shape
    COUT = kp["wredT"].shape[0]
    HW = H * W

    x_f32 = x_nchw.astype(jnp.float32)
    x_packed = pack_input(x_f32, kp["shifts"], H, W)          # (B, K_total, HW)

    # Global-pool branch in plain JAX (trivial FLOPs, keeps kernel tiling clean)
    pooled = jnp.mean(x_f32, axis=(2, 3))                     # (B, C_in)
    g = jnp.dot(pooled, kp["wg"])
    g = _leaky(g * kp["g_s"][None, :] + kp["g_b"][None, :])
    g = jnp.dot(g, kp["wpool"]).reshape(B, COUT, 1)           # (B, COUT, 1)

    out_flat = pl.pallas_call(
        aspp_kernel,
        out_shape=jax.ShapeDtypeStruct((B, COUT, HW), jnp.float32),
        grid=(B,),
        in_specs=[
            pl.BlockSpec((1, K_total, HW), lambda b: (b, 0, 0)),   # x_packed
            pl.BlockSpec((HID4, K_total), lambda b: (0, 0)),       # w_allT
            pl.BlockSpec((HID4, 1), lambda b: (0, 0)),             # map_s
            pl.BlockSpec((HID4, 1), lambda b: (0, 0)),             # map_b
            pl.BlockSpec((COUT, HID4), lambda b: (0, 0)),          # wredT
            pl.BlockSpec((COUT, 1), lambda b: (0, 0)),             # red_s
            pl.BlockSpec((COUT, 1), lambda b: (0, 0)),             # red_b
            pl.BlockSpec((1, COUT, 1), lambda b: (b, 0, 0)),       # g
        ],
        out_specs=pl.BlockSpec((1, COUT, HW), lambda b: (b, 0, 0)),
        compiler_params=pltpu.CompilerParams(
            dimension_semantics=("parallel",)),
    )(x_packed, kp["w_allT"], kp["map_s"], kp["map_b"], kp["wredT"],
      kp["red_s"], kp["red_b"], g)

    return out_flat.reshape(B, COUT, H, W)


# -------------------- deterministic PyTorch-style parameters -----------------
def init_torch_params(key, C_in, HID, COUT):
    ks = jax.random.split(key, 20)

    def nrm(k, shape, scale=0.1):
        return scale * jax.random.normal(k, shape, jnp.float32)

    return dict(
        w0=nrm(ks[0], (HID, C_in, 1, 1)),
        w1=nrm(ks[1], (HID, C_in, 3, 3)),
        w2=nrm(ks[2], (HID, C_in, 3, 3)),
        w3=nrm(ks[3], (HID, C_in, 3, 3)),
        map_gamma=1.0 + nrm(ks[4], (4 * HID,)),
        map_beta=nrm(ks[5], (4 * HID,)),
        map_mean=nrm(ks[6], (4 * HID,)),
        map_var=1.0 + 0.5 * jax.random.uniform(ks[7], (4 * HID,), jnp.float32),
        wg=nrm(ks[8], (HID, C_in, 1, 1)),
        g_gamma=1.0 + nrm(ks[9], (HID,)),
        g_beta=nrm(ks[10], (HID,)),
        g_mean=nrm(ks[11], (HID,)),
        g_var=1.0 + 0.5 * jax.random.uniform(ks[12], (HID,), jnp.float32),
        wred=nrm(ks[13], (COUT, 4 * HID, 1, 1)),
        wpool=nrm(ks[14], (COUT, HID, 1, 1)),
        red_gamma=1.0 + nrm(ks[15], (COUT,)),
        red_beta=nrm(ks[16], (COUT,)),
        red_mean=nrm(ks[17], (COUT,)),
        red_var=1.0 + 0.5 * jax.random.uniform(ks[18], (COUT,), jnp.float32),
    )


# -------------------- pure-JAX reference (matches PyTorch forward) -----------
def _conv_nchw(x, w, dilation=1, padding=0):
    return jax.lax.conv_general_dilated(
        x, w, window_strides=(1, 1),
        padding=[(padding, padding), (padding, padding)],
        rhs_dilation=(dilation, dilation),
        dimension_numbers=("NCHW", "OIHW", "NCHW"))


def reference_aspp(x, tp, dilations=(12, 24, 36)):
    def bn(v, g, b, m, var):
        g, b, m, var = (t[None, :, None, None] for t in (g, b, m, var))
        return (v - m) / jnp.sqrt(var + BN_EPS) * g + b

    outs = [_conv_nchw(x, tp["w0"])]
    for k, d in zip(("w1", "w2", "w3"), dilations):
        outs.append(_conv_nchw(x, tp[k], dilation=d, padding=d))
    out = jnp.concatenate(outs, axis=1)
    out = _leaky(bn(out, tp["map_gamma"], tp["map_beta"],
                    tp["map_mean"], tp["map_var"]))
    out = _conv_nchw(out, tp["wred"])

    pool = jnp.mean(x, axis=(2, 3))[:, :, None, None]
    pool = _conv_nchw(pool, tp["wg"])
    pool = _leaky(bn(pool, tp["g_gamma"], tp["g_beta"],
                     tp["g_mean"], tp["g_var"]))
    pool = _conv_nchw(pool, tp["wpool"])
    pool = jnp.broadcast_to(pool, out.shape)

    out = out + pool
    out = _leaky(bn(out, tp["red_gamma"], tp["red_beta"],
                    tp["red_mean"], tp["red_var"]))
    return out


if __name__ == "__main__":
    B, C_in, H, W = 2, 4, 16, 16
    HID, COUT = 32, 16
    dilations = (12, 24, 36)

    key = jax.random.PRNGKey(0)
    kx, kp_key = jax.random.split(key)
    x = jax.random.normal(kx, (B, C_in, H, W), jnp.float32)

    torch_params = init_torch_params(kp_key, C_in, HID, COUT)
    kernel_params = to_kernel_params(torch_params, C_in, HID, COUT,
                                     dilations, H, W)

    out = aspp_forward(x, kernel_params)
    out = jax.block_until_ready(out)

    ref = reference_aspp(x, torch_params, dilations)
    assert out.shape == ref.shape == (B, COUT, H, W)
    err = float(jnp.max(jnp.abs(out - ref)))
    if err > 5e-2:
        raise AssertionError(f"mismatch vs reference: max abs err {err}")
    print("KERNEL_OK")
</pallas_src>

<mosaic_0001>
module attributes {stable_mosaic.version = 11 : i64} {
  func.func @aspp_kernel(%arg0: i32, %arg1: memref<1x36x256xf32, #tpu.memory_space<vmem>>, %arg2: memref<128x36xf32, #tpu.memory_space<vmem>>, %arg3: memref<128x1xf32, #tpu.memory_space<vmem>>, %arg4: memref<128x1xf32, #tpu.memory_space<vmem>>, %arg5: memref<16x128xf32, #tpu.memory_space<vmem>>, %arg6: memref<16x1xf32, #tpu.memory_space<vmem>>, %arg7: memref<16x1xf32, #tpu.memory_space<vmem>>, %arg8: memref<1x16x1xf32, #tpu.memory_space<vmem>>, %arg9: memref<1x16x256xf32, #tpu.memory_space<vmem>>) attributes {dimension_semantics = [#tpu.dimension_semantics<parallel>], iteration_bounds = array<i64: 2>, scalar_prefetch = 0 : i64, scratch_operands = 0 : i64, tpu.core_type = #tpu.core_type<tc>, window_params = [{transform_indices = @transform_0, window_bounds = array<i64: 1, 36, 256>}, {pipeline_mode = #tpu.pipeline_mode<synchronous>, transform_indices = @transform_1, window_bounds = array<i64: 128, 36>}, {pipeline_mode = #tpu.pipeline_mode<synchronous>, transform_indices = @transform_2, window_bounds = array<i64: 128, 1>}, {pipeline_mode = #tpu.pipeline_mode<synchronous>, transform_indices = @transform_3, window_bounds = array<i64: 128, 1>}, {pipeline_mode = #tpu.pipeline_mode<synchronous>, transform_indices = @transform_4, window_bounds = array<i64: 16, 128>}, {pipeline_mode = #tpu.pipeline_mode<synchronous>, transform_indices = @transform_5, window_bounds = array<i64: 16, 1>}, {pipeline_mode = #tpu.pipeline_mode<synchronous>, transform_indices = @transform_6, window_bounds = array<i64: 16, 1>}, {transform_indices = @transform_7, window_bounds = array<i64: 1, 16, 1>}, {transform_indices = @transform_8, window_bounds = array<i64: 1, 16, 256>}]} {
    %c0 = arith.constant 0 : index
    %c0_0 = arith.constant 0 : index
    %c0_1 = arith.constant 0 : index
    %0 = vector.load %arg1[%c0, %c0_0, %c0_1] : memref<1x36x256xf32, #tpu.memory_space<vmem>>, vector<1x36x256xf32>
    %1 = vector.shape_cast %0 : vector<1x36x256xf32> to vector<36x256xf32>
    %c0_2 = arith.constant 0 : index
    %c0_3 = arith.constant 0 : index
    %2 = vector.load %arg2[%c0_2, %c0_3] : memref<128x36xf32, #tpu.memory_space<vmem>>, vector<128x36xf32>
    %cst = arith.constant dense<0.000000e+00> : vector<128x256xf32>
    %3 = tpu.matmul %2, %1, %cst {dimension_numbers = #tpu.dot_dimension_numbers<[1], [0], [0], [1], [0, 0, 1, 1], [], []>} : vector<128x36xf32>, vector<36x256xf32>, vector<128x256xf32> -> vector<128x256xf32>
    %c0_4 = arith.constant 0 : index
    %c0_5 = arith.constant 0 : index
    %4 = vector.load %arg3[%c0_4, %c0_5] : memref<128x1xf32, #tpu.memory_space<vmem>>, vector<128x1xf32>
    %5 = vector.broadcast %4 : vector<128x1xf32> to vector<128x256xf32>
    %6 = arith.mulf %3, %5 : vector<128x256xf32>
    %c0_6 = arith.constant 0 : index
    %c0_7 = arith.constant 0 : index
    %7 = vector.load %arg4[%c0_6, %c0_7] : memref<128x1xf32, #tpu.memory_space<vmem>>, vector<128x1xf32>
    %8 = vector.broadcast %7 : vector<128x1xf32> to vector<128x256xf32>
    %9 = arith.addf %6, %8 : vector<128x256xf32>
    %cst_8 = arith.constant 0.000000e+00 : f32
    %10 = vector.broadcast %cst_8 : f32 to vector<128x256xf32>
    %11 = arith.cmpf oge, %9, %10 : vector<128x256xf32>
    %cst_9 = arith.constant 0.00999999977 : f32
    %12 = vector.broadcast %cst_9 : f32 to vector<128x256xf32>
    %13 = arith.mulf %9, %12 : vector<128x256xf32>
    %14 = arith.select %11, %9, %13 : vector<128x256xi1>, vector<128x256xf32>
    %c0_10 = arith.constant 0 : index
    %c0_11 = arith.constant 0 : index
    %15 = vector.load %arg5[%c0_10, %c0_11] : memref<16x128xf32, #tpu.memory_space<vmem>>, vector<16x128xf32>
    %cst_12 = arith.constant dense<0.000000e+00> : vector<16x256xf32>
    %16 = tpu.matmul %15, %14, %cst_12 {dimension_numbers = #tpu.dot_dimension_numbers<[1], [0], [0], [1], [0, 0, 1, 1], [], []>} : vector<16x128xf32>, vector<128x256xf32>, vector<16x256xf32> -> vector<16x256xf32>
    %c0_13 = arith.constant 0 : index
    %c0_14 = arith.constant 0 : index
    %c0_15 = arith.constant 0 : index
    %17 = vector.load %arg8[%c0_13, %c0_14, %c0_15] : memref<1x16x1xf32, #tpu.memory_space<vmem>>, vector<1x16x1xf32>
    %18 = vector.shape_cast %17 : vector<1x16x1xf32> to vector<16x1xf32>
    %19 = vector.broadcast %18 : vector<16x1xf32> to vector<16x256xf32>
    %20 = arith.addf %16, %19 : vector<16x256xf32>
    %c0_16 = arith.constant 0 : index
    %c0_17 = arith.constant 0 : index
    %21 = vector.load %arg6[%c0_16, %c0_17] : memref<16x1xf32, #tpu.memory_space<vmem>>, vector<16x1xf32>
    %22 = vector.broadcast %21 : vector<16x1xf32> to vector<16x256xf32>
    %23 = arith.mulf %20, %22 : vector<16x256xf32>
    %c0_18 = arith.constant 0 : index
    %c0_19 = arith.constant 0 : index
    %24 = vector.load %arg7[%c0_18, %c0_19] : memref<16x1xf32, #tpu.memory_space<vmem>>, vector<16x1xf32>
    %25 = vector.broadcast %24 : vector<16x1xf32> to vector<16x256xf32>
    %26 = arith.addf %23, %25 : vector<16x256xf32>
    %cst_20 = arith.constant 0.000000e+00 : f32
    %27 = vector.broadcast %cst_20 : f32 to vector<16x256xf32>
    %28 = arith.cmpf oge, %26, %27 : vector<16x256xf32>
    %cst_21 = arith.constant 0.00999999977 : f32
    %29 = vector.broadcast %cst_21 : f32 to vector<16x256xf32>
    %30 = arith.mulf %26, %29 : vector<16x256xf32>
    %31 = arith.select %28, %26, %30 : vector<16x256xi1>, vector<16x256xf32>
    %c0_22 = arith.constant 0 : index
    %c0_23 = arith.constant 0 : index
    %c0_24 = arith.constant 0 : index
    %32 = vector.load %arg9[%c0_22, %c0_23, %c0_24] : memref<1x16x256xf32, #tpu.memory_space<vmem>>, vector<1x16x256xf32>
    %33 = vector.shape_cast %32 : vector<1x16x256xf32> to vector<16x256xf32>
    %34 = vector.shape_cast %31 : vector<16x256xf32> to vector<1x16x256xf32>
    tpu.vector_store %arg9[%c0_22, %c0_23, %c0_24], %34 {strides = array<i32>} : memref<1x16x256xf32, #tpu.memory_space<vmem>>, vector<1x16x256xf32>,
    return
  }
  func.func @transform_0(%arg0: i32) -> (i32, i32, i32) {
    %c0_i32 = arith.constant 0 : i32
    %c0_i32_0 = arith.constant 0 : i32
    %c0_i32_1 = arith.constant 0 : i32
    return %arg0, %c0_i32, %c0_i32_0 : i32, i32, i32
  }
  func.func @transform_1(%arg0: i32) -> (i32, i32) {
    %c0_i32 = arith.constant 0 : i32
    %c0_i32_0 = arith.constant 0 : i32
    %c0_i32_1 = arith.constant 0 : i32
    return %c0_i32, %c0_i32_0 : i32, i32
  }
  func.func @transform_2(%arg0: i32) -> (i32, i32) {
    %c0_i32 = arith.constant 0 : i32
    %c0_i32_0 = arith.constant 0 : i32
    %c0_i32_1 = arith.constant 0 : i32
    return %c0_i32, %c0_i32_0 : i32, i32
  }
  func.func @transform_3(%arg0: i32) -> (i32, i32) {
    %c0_i32 = arith.constant 0 : i32
    %c0_i32_0 = arith.constant 0 : i32
    %c0_i32_1 = arith.constant 0 : i32
    return %c0_i32, %c0_i32_0 : i32, i32
  }
  func.func @transform_4(%arg0: i32) -> (i32, i32) {
    %c0_i32 = arith.constant 0 : i32
    %c0_i32_0 = arith.constant 0 : i32
    %c0_i32_1 = arith.constant 0 : i32
    return %c0_i32, %c0_i32_0 : i32, i32
  }
  func.func @transform_5(%arg0: i32) -> (i32, i32) {
    %c0_i32 = arith.constant 0 : i32
    %c0_i32_0 = arith.constant 0 : i32
    %c0_i32_1 = arith.constant 0 : i32
    return %c0_i32, %c0_i32_0 : i32, i32
  }
  func.func @transform_6(%arg0: i32) -> (i32, i32) {
    %c0_i32 = arith.constant 0 : i32
    %c0_i32_0 = arith.constant 0 : i32
    %c0_i32_1 = arith.constant 0 : i32
    return %c0_i32, %c0_i32_0 : i32, i32
  }
  func.func @transform_7(%arg0: i32) -> (i32, i32, i32) {
    %c0_i32 = arith.constant 0 : i32
    %c0_i32_0 = arith.constant 0 : i32
    %c0_i32_1 = arith.constant 0 : i32
    return %arg0, %c0_i32, %c0_i32_0 : i32, i32, i32
  }
  func.func @transform_8(%arg0: i32) -> (i32, i32, i32) {
    %c0_i32 = arith.constant 0 : i32
    %c0_i32_0 = arith.constant 0 : i32
    %c0_i32_1 = arith.constant 0 : i32
    return %arg0, %c0_i32, %c0_i32_0 : i32, i32, i32
  }
}

</mosaic_0001>

<bundles_post_ra>
// kernel: tpu_custom_call.1
= control target key start
LH: loop header
LB: loop body
LE: loop exit
PB: predicated region body
PF: predicated region fallthrough
CT: control target
= control target key end

     0   :  { %13 = vsyncpa [#allocation3], 0  ;;  %s1790_s0 = inlined_call_operand.vmem [shape: f32[2,36,256], index: 0, kind: input, shape index: {}]   ;;  %s1791_s1 = inlined_call_operand.vmem [shape: f32[128,36], index: 1, kind: input, shape index: {}]   ;;  %s1792_s2 = inlined_call_operand.vmem [shape: f32[128,1], index: 2, kind: input, shape index: {}]   ;;  %s1793_s3 = inlined_call_operand.vmem [shape: f32[128,1], index: 3, kind: input, shape index: {}]   ;;  %s1794_s4 = inlined_call_operand.vmem [shape: f32[16,128], index: 4, kind: input, shape index: {}]   ;;  %s1795_s5 = inlined_call_operand.vmem [shape: f32[16,1], index: 5, kind: input, shape index: {}]   ;;  %s1796_s6 = inlined_call_operand.vmem [shape: f32[16,1], index: 6, kind: input, shape index: {}]   ;;  %s1797_s7 = inlined_call_operand.vmem [shape: f32[2,16,1], index: 7, kind: input, shape index: {}]   ;;  %s1798_s8 = inlined_call_operand.hbm [shape: f32[2,16,256], index: 8, kind: output, shape index: {}]  }
   0x1   :  { %15 = vsyncpa [#allocation3 + $0x1], 0  ;;  %s1303_s27 = smov 0   ;;  %s1305_s28 = smov 0  }
   0x2   :  { %s1307_s29 = smov 0   ;;  %s1309_s30 = smov 0  }
   0x3 LB: > { %s1324_s9 = sadd.s32 4294967295, %s1253_s30   ;;  %s1086_s10 = sadd.s32 4294967294, %s1253_s30   ;;  %s1253_s30 = sphi %s1309_s30, %s1804_s30   ;;  %s1249_s29 = sphi %s1307_s29, %s1803_s29   ;;  %s1245_s28 = sphi %s1305_s28, %s1802_s28   ;;  %s1241_s27 = sphi %s1303_s27, %s1801_s27  }
   0x4   : > { %s1328_s11 = sadd.s32 1, %s1253_s30   ;;  %s206_s12 = sadd.s32 1, %s1249_s29 }
   0x5   : > { %s203_s13 = ssub.s32 %s1253_s30, %s1328_s11  ;;  %p216_p0 = scmp.ne.s32.totalorder %s1249_s29, %s1245_s28 }
   0x6   : > { %p204_p1 = scmp.eq.s32.totalorder %s203_s13, 0  ;;  %p217_p2 = scmp.eq.s32.totalorder %s1324_s9, 1 }
   0x7   : > { %p222_p3 = scmp.ne.s32.totalorder %s1245_s28, %s1241_s27  ;;  %p223_p4 = scmp.eq.s32.totalorder %s1086_s10, 1 }
   0x8   : > { %s1339_s14 = scalar_select %p204_p1, %s1249_s29, %s206_s12  }
   0x9   : > { %p1341_p5 = por %p217_p2, %p216_p0  ;;  %p1345_p6 = por %p223_p4, %p222_p3 }
   0xa   : > { %p1089_p7 = scmp.ge.s32.totalorder %s1253_s30, 1  ;;  %p275_p8 = scmp.lt.s32.totalorder %s1253_s30, 3 }
   0xc   : > { %p276_p9 = pnand %p1089_p7, %p275_p8 }
   0xd   : > { %p314_p10 = scmp.lt.s32.totalorder (!%p276_p9), %s1324_s9, 1  ;;  %s311_s25 = sand.u32 (!%p276_p9), 1, %s1245_s28  }
   0xe   : > { %279 = sbr.rel (%p276_p9) target bundleno = 413 (0x19d), region = 52  ;;  %s1134_s12 = sshll.u32 (!%p276_p9), %s1324_s9, 5 }
   0xf   : > { %s1008_s17 = scalar_lea.hbm (!%p276_p9), %s1798_s8, %s1134_s12 }
  0x10   : > { %s1011_s19 = sshll.u32 (!%p276_p9), %s1008_s17, 4  ;;  %s1012_s19 = int_to_ptr.hbm [resolvable:$true] %s1011_s19 }
  0x13   : > { %v678_v0 = vld [vmem:[%s1793_s3 + $0x70] sm:$0xff]  ;;  %v679_v1 = vld [vmem:[%s1793_s3 + $0x78] sm:$0xff]  ;;  %v1255_v3 = vmov 0   ;;  %s1362_s23 = scalar_select %p314_p10, %s1324_s9, 1  ;;  %vm399_vm0 = vcmask 1043456   ;;  %v548_v4 = vld [vmem:[%s1792_s2 + $0x60] sm:$0xff] }
  0x14   : > { %v551_v2 = vld [vmem:[%s1792_s2 + $0x78] sm:$0xff]  ;;  %1190 = vset.pattern.permute.xlu2 %v1255_v3  ;;  %1189 = vset.pattern.permute.xlu1 %v1255_v3  ;;  %v550_v8 = vld [vmem:[%s1792_s2 + $0x70] sm:$0xff]  ;;  %v549_v9 = vld [vmem:[%s1792_s2 + $0x68] sm:$0xff]  ;;  %vm350_vm1 = vcmask 293888   ;;  %s997_s9 = scalar_lea.sflag [#allocation3], %s311_s25 }
  0x15   : > { %1188 = vset.pattern.permute.xlu0 %v1255_v3  ;;  %752 = vperm.xlu2 %1190, %v678_v0   ;;  %s1145_s24 = smul.u32 80, %s1362_s23  ;;  %v334_v17 = vld [vmem:[%s1791_s1] sm:$0xff]  ;;  %v344_v18 = vld [vmem:[%s1791_s1 + $0x50] sm:$0xff]  ;;  %v1386_v19 = vld [vmem:[%s1791_s1 + $0x48] sm:$0xff] }
  0x16   : > { %757 = vperm.xlu1 %1189, %v679_v1   ;;  %629 = vperm.xlu0 %1188, %v551_v2   ;;  %v677_v20 = vld [vmem:[%s1793_s3 + $0x68] sm:$0xff]  ;;  %v676_v21 = vld [vmem:[%s1793_s3 + $0x60] sm:$0xff]  ;;  %v547_v22 = vld [vmem:[%s1792_s2 + $0x58] sm:$0xff] }
  0x17   : > { %s318_s10 = scalar_lea.vmem %s1790_s0, %s1145_s24  ;;  %v335_v23 = vld [vmem:[%s1791_s1 + $0x8] sm:$0xff]  ;;  %v345_v24 = vld [vmem:[%s1791_s1 + $0x58] sm:$0xff]  ;;  %v546_v25 = vld [vmem:[%s1792_s2 + $0x50] sm:$0xff] }
  0x18   : > { %v332_v5 = vld [vmem:[%s318_s10 + $0x40] sm:$0xf]  ;;  %v333_v6 = vld [vmem:[%s318_s10 + $0x48] sm:$0xf]  ;;  %v330_v7 = vld [vmem:[%s318_s10 + $0x30] sm:$0xff] }
  0x19   : > { %1094 = vmatpush.msk.msra.mxu0 %vm399_vm0, %v332_v5  ;;  %1135 = vmatpush.msk.msra.mxu2 %vm399_vm0, %v332_v5  ;;  %v331_v10 = vld [vmem:[%s318_s10 + $0x38] sm:$0xff]  ;;  %v328_v11 = vld [vmem:[%s318_s10 + $0x20] sm:$0xff]  ;;  %v329_v12 = vld [vmem:[%s318_s10 + $0x28] sm:$0xff] }
  0x1a   : > { %1111 = vmatpush.msk.msra.mxu1 %vm399_vm0, %v333_v6  ;;  %1140 = vmatpush.msk.msra.mxu3 %vm399_vm0, %v333_v6  ;;  %v326_v13 = vld [vmem:[%s318_s10 + $0x10] sm:$0xff]  ;;  %v327_v14 = vld [vmem:[%s318_s10 + $0x18] sm:$0xff]  ;;  %v324_v15 = vld [vmem:[%s318_s10] sm:$0xff] }
  0x1b   : > { %418 = vmatpush.msra.mxu0 %v330_v7  ;;  %1136 = vmatpush.msra.mxu2 %v330_v7  ;;  %v325_v16 = vld [vmem:[%s318_s10 + $0x8] sm:$0xff]  ;;  %v675_v26 = vld [vmem:[%s1793_s3 + $0x58] sm:$0xff]  ;;  %v336_v28 = vld [vmem:[%s1791_s1 + $0x10] sm:$0xff]  ;;  %s1133_s10 = sshll.u32 %s1362_s23, 4  ;;  %s1090_s23 = sshll.u32 %s311_s25, 5 }
  0x1c   : > { %483 = vmatpush.msra.mxu1 %v331_v10  ;;  %1141 = vmatpush.msra.mxu3 %v331_v10  ;;  %v545_v27 = vld [vmem:[%s1792_s2 + $0x48] sm:$0xff]  ;;  %v346_v29 = vld [vmem:[%s1791_s1 + $0x60] sm:$0xff]  ;;  %v674_v30 = vld [vmem:[%s1793_s3 + $0x50] sm:$0xff]  ;;  %s323_s20 = scalar_lea.vmem %s1797_s7, %s1133_s10  ;;  %s313_s26 = scalar_lea.vmem [#allocation2], %s1090_s23 }
  0x1d   : > { %614 = vperm.xlu2 %1190, %v548_v4   ;;  %419 = vmatpush.msra.mxu0 %v328_v11  ;;  %v673_v31 = vld [vmem:[%s1793_s3 + $0x48] sm:$0xff]  ;;  %v544_v32 = vld [vmem:[%s1792_s2 + $0x40] sm:$0xff]  ;;  %v337_v33 = vld [vmem:[%s1791_s1 + $0x18] sm:$0xff]  ;;  %s1009_s18 = sshll.u32 %s313_s26, 4  ;;  %s1211_s23 = scalar_lea.hbm %s1798_s8, 64  ;;  %s1010_s18 = int_to_ptr.vmem [resolvable:$true] %s1009_s18 }
  0x1e   : > { %624 = vperm.xlu0 %1188, %v550_v8   ;;  %619 = vperm.xlu1 %1189, %v549_v9   ;;  %v347_v34 = vld [vmem:[%s1791_s1 + $0x68] sm:$0xff]  ;;  %v543_v35 = vld [vmem:[%s1792_s2 + $0x38] sm:$0xff]  ;;  %v672_v36 = vld [vmem:[%s1793_s3 + $0x40] sm:$0xff] }
  0x1f   : > { %1137 = vmatpush.msra.mxu2 %v328_v11  ;;  %484 = vmatpush.msra.mxu1 %v329_v12  ;;  %v542_v37 = vld [vmem:[%s1792_s2 + $0x30] sm:$0xff]  ;;  %v338_v38 = vld [vmem:[%s1791_s1 + $0x20] sm:$0xff]  ;;  %v671_v40 = vld [vmem:[%s1793_s3 + $0x38] sm:$0xff] }
  0x20   : > { %1142 = vmatpush.msra.mxu3 %v329_v12  ;;  %420 = vmatpush.msra.mxu0 %v326_v13  ;;  %v348_v39 = vld [vmem:[%s1791_s1 + $0x70] sm:$0xff]  ;;  %v541_v42 = vld [vmem:[%s1792_s2 + $0x28] sm:$0xff]  ;;  %v349_v44 = vld [vmem:[%s1791_s1 + $0x78] sm:$0xff] }
  0x21   : > { %1138 = vmatpush.msra.mxu2 %v326_v13  ;;  %485 = vmatpush.msra.mxu1 %v327_v14  ;;  %v670_v41 = vld [vmem:[%s1793_s3 + $0x30] sm:$0xff]  ;;  %v339_v43 = vld [vmem:[%s1791_s1 + $0x28] sm:$0xff]  ;;  %v540_v45 = vld [vmem:[%s1792_s2 + $0x20] sm:$0xff] }
  0x22   : > { %1143 = vmatpush.msra.mxu3 %v327_v14  ;;  %421 = vmatpush.msra.mxu0 %v324_v15  ;;  %v669_v46 = vld [vmem:[%s1793_s3 + $0x28] sm:$0xff]  ;;  %v539_v47 = vld [vmem:[%s1792_s2 + $0x18] sm:$0xff]  ;;  %v340_v48 = vld [vmem:[%s1791_s1 + $0x30] sm:$0xff] }
  0x23   : > { %1139 = vmatpush.msra.mxu2 %v324_v15  ;;  %486 = vmatpush.msra.mxu1 %v325_v16  ;;  %v668_v49 = vld [vmem:[%s1793_s3 + $0x20] sm:$0xff]  ;;  %v667_v50 = vld [vmem:[%s1793_s3 + $0x18] sm:$0xff]  ;;  %v538_v51 = vld [vmem:[%s1792_s2 + $0x10] sm:$0xff] }
  0x24   : > { %1144 = vmatpush.msra.mxu3 %v325_v16  ;;  %1095 = vmatmul.msk.f32.vlgmr.msra.gmra.mxu0 %vm350_vm1, %v334_v17  ;;  %v341_v52 = vld [vmem:[%s1791_s1 + $0x38] sm:$0xff]  ;;  %v537_v53 = vld [vmem:[%s1792_s2 + $0x8] sm:$0xff]  ;;  %v666_v54 = vld [vmem:[%s1793_s3 + $0x10] sm:$0xff] }
  0x25   : > { %1105 = vmatmul.msk.f32.vlgmr.msra.gmra.mxu2 %vm350_vm1, %v344_v18  ;;  %1112 = vmatmul.msk.f32.vlgmr.msra.gmra.mxu1 %vm350_vm1, %v334_v17  ;;  %v536_v55 = vld [vmem:[%s1792_s2] sm:$0xff]  ;;  %v665_v57 = vld [vmem:[%s1793_s3 + $0x8] sm:$0xff] }
  0x26   : > { %1121 = vmatmul.msk.f32.vlgmr.msra.gmra.mxu3 %vm350_vm1, %v1386_v19  ;;  %747 = vperm.xlu0 %1188, %v677_v20   ;;  %v342_v56 = vld [vmem:[%s1791_s1 + $0x40] sm:$0xff]  ;;  %v891_v60 = vld [vmem:[%s323_s20 + $0x8] sm:$0xff] }
  0x27   : > { %742 = vperm.xlu2 %1190, %v676_v21   ;;  %609 = vperm.xlu1 %1189, %v547_v22   ;;  %v664_v58 = vld [vmem:[%s1793_s3] sm:$0xff]  ;;  %v949_v62 = vld [vmem:[%s1795_s5 + $0x8] sm:$0xff] }
  0x28   : > { %v890_v59 = vld [vmem:[%s323_s20] sm:$0xff]  ;;  %v965_v0 = vld [vmem:[%s1796_s6 + $0x8] sm:$0xff]  ;;  %s1205_s20 = sshra.s32 %s1012_s19, 4  ;;  %s1206_s20 = int_to_ptr.hbm [resolvable:$true] %s1205_s20 }
  0x29   : > { %v948_v61 = vld [vmem:[%s1795_s5] sm:$0xff]  ;;  %s1207_s21 = scalar_lea.hbm %s1206_s20, 32  ;;  %p1212_p0 = scmp.lt.s32.totalorder %s1206_s20, %s1798_s8 }
  0x2a   : > { %v964_v63 = vld [vmem:[%s1796_s6] sm:$0xff]  ;;  %p1208_p11 = scmp.ne.s32.totalorder %s1206_s20, %s1207_s21  ;;  %p1213_p1 = scmp.lt.s32.totalorder %s1211_s23, %s1207_s21 }
  0x2c   : > { %1096 = vmatmul.msk.f32.gmra.mxu0 %vm350_vm1, %v335_v23  ;;  %p1209_p12 = pnand %p1208_p11, %p1341_p5  ;;  %p1214_p2 = por %p1213_p1, %p1212_p0 }
  0x2d   : > { %1106 = vmatmul.msk.f32.gmra.mxu2 %vm350_vm1, %v345_v24  ;;  %1113 = vmatmul.msk.f32.gmra.mxu1 %vm350_vm1, %v335_v23 }
  0x2e   : > { %1122 = vmatmul.msk.f32.gmra.mxu3 %vm350_vm1, %v344_v18  ;;  %604 = vperm.xlu0 %1188, %v546_v25   ;;  %p1210_p13 = pneg %p1209_p12 }
  0x2f   : > { %737 = vperm.xlu1 %1189, %v675_v26   ;;  %599 = vperm.xlu2 %1190, %v545_v27  }
  0x30   : > { %p1215_p3 = pnand %p1214_p2, %p1210_p13 }
  0x34   : > { %1097 = vmatmul.msk.f32.gmra.mxu0 %vm350_vm1, %v336_v28 }
  0x35   : > { %1107 = vmatmul.msk.f32.gmra.mxu2 %vm350_vm1, %v346_v29  ;;  %1114 = vmatmul.msk.f32.gmra.mxu1 %vm350_vm1, %v336_v28 }
  0x36   : > { %1123 = vmatmul.msk.f32.gmra.mxu3 %vm350_vm1, %v345_v24  ;;  %732 = vperm.xlu0 %1188, %v674_v30  }
  0x37   : > { %727 = vperm.xlu2 %1190, %v673_v31   ;;  %594 = vperm.xlu1 %1189, %v544_v32  }
  0x3c   : > { %1098 = vmatmul.msk.f32.gmra.mxu0 %vm350_vm1, %v337_v33 }
  0x3d   : > { %1108 = vmatmul.msk.f32.gmra.mxu2 %vm350_vm1, %v347_v34  ;;  %1115 = vmatmul.msk.f32.gmra.mxu1 %vm350_vm1, %v337_v33 }
  0x3e   : > { %1124 = vmatmul.msk.f32.gmra.mxu3 %vm350_vm1, %v346_v29  ;;  %589 = vperm.xlu0 %1188, %v543_v35  }
  0x3f   : > { %722 = vperm.xlu1 %1189, %v672_v36   ;;  %584 = vperm.xlu2 %1190, %v542_v37  }
  0x44   : > { %1099 = vmatmul.msk.f32.gmra.mxu0 %vm350_vm1, %v338_v38 }
  0x45   : > { %1109 = vmatmul.msk.f32.gmra.mxu2 %vm350_vm1, %v348_v39  ;;  %1116 = vmatmul.msk.f32.gmra.mxu1 %vm350_vm1, %v338_v38 }
  0x46   : > { %1125 = vmatmul.msk.f32.gmra.mxu3 %vm350_vm1, %v347_v34  ;;  %717 = vperm.xlu0 %1188, %v671_v40  }
  0x47   : > { %712 = vperm.xlu2 %1190, %v670_v41   ;;  %579 = vperm.xlu1 %1189, %v541_v42  }
  0x4c   : > { %1100 = vmatmul.msk.f32.gmra.mxu0 %vm350_vm1, %v339_v43 }
  0x4d   : > { %1110 = vmatmul.msk.f32.gmra.mxu2 %vm350_vm1, %v349_v44  ;;  %1117 = vmatmul.msk.f32.gmra.mxu1 %vm350_vm1, %v339_v43 }
  0x4e   : > { %1126 = vmatmul.msk.f32.gmra.mxu3 %vm350_vm1, %v348_v39  ;;  %574 = vperm.xlu0 %1188, %v540_v45  }
  0x4f   : > { %707 = vperm.xlu1 %1189, %v669_v46   ;;  %569 = vperm.xlu2 %1190, %v539_v47  }
  0x54   : > { %1101 = vmatmul.msk.f32.gmra.mxu0 %vm350_vm1, %v340_v48 }
  0x55   : > { %1118 = vmatmul.msk.f32.gmra.mxu1 %vm350_vm1, %v340_v48 }
  0x56   : > { %1127 = vmatmul.msk.f32.gmra.mxu3 %vm350_vm1, %v349_v44  ;;  %702 = vperm.xlu0 %1188, %v668_v49  }
  0x57   : > { %697 = vperm.xlu2 %1190, %v667_v50   ;;  %564 = vperm.xlu1 %1189, %v538_v51  }
  0x5c   : > { %1102 = vmatmul.msk.f32.gmra.mxu0 %vm350_vm1, %v341_v52 }
  0x5d   : > { %1119 = vmatmul.msk.f32.gmra.mxu1 %vm350_vm1, %v341_v52 }
  0x5e   : > { %559 = vperm.xlu0 %1188, %v537_v53  }
  0x5f   : > { %692 = vperm.xlu1 %1189, %v666_v54   ;;  %554 = vperm.xlu2 %1190, %v536_v55  }
  0x64   : > { %1103 = vmatmul.msk.f32.gmra.mxu0 %vm350_vm1, %v342_v56 }
  0x65   : > { %1120 = vmatmul.msk.f32.gmra.mxu1 %vm350_vm1, %v342_v56 }
  0x66   : > { %687 = vperm.xlu0 %1188, %v665_v57  }
  0x67   : > { %682 = vperm.xlu1 %1189, %v664_v58   ;;  %894 = vperm.xlu2 %1190, %v890_v59  }
  0x6c   : > { %1104 = vmatmul.msk.f32.gmra.mxu0 %vm350_vm1, %v1386_v19 }
  0x6e   : > { %899 = vperm.xlu0 %1188, %v891_v60  }
  0x6f   : > { %952 = vperm.xlu1 %1189, %v948_v61   ;;  %957 = vperm.xlu2 %1190, %v949_v62   ;;  %v1555_v1 = vpop.permute.xlu2 %752 }
  0x76   : > { %968 = vperm.xlu0 %1188, %v964_v63  }
  0x77   : > { %973 = vperm.xlu1 %1189, %v965_v0   ;;  %v1561_v4 = vpop.permute.xlu2 %614 }
  0x81   : > { %v1565_v7 = vpop.permute.xlu2 %742 }
  0x88   : > { %v1557_v2 = vpop.permute.xlu0 %629  ;;  %v1559_v3 = vpop.permute.xlu1 %757 }
  0x89   : > { %v1575_v13 = vpop.permute.xlu2 %599 }
  0x90   : > { %v625_v5 = vpop.permute.xlu0 %624  ;;  %v1563_v6 = vpop.permute.xlu1 %619 }
  0x91   : > { %v1589_v22 = vpop.permute.xlu2 %727 }
  0x98   : > { %v1567_v8 = vpop.permute.xlu0 %747 }
  0x99   : > { %v1573_v11 = vpop.permute.xlu1 %609  ;;  %v1603_v30 = vpop.permute.xlu2 %584 }
  0xa0   : > { %v1579_v16 = vpop.permute.xlu0 %604 }
  0xa1   : > { %v1569_v9 = vpop.f32.mrf.mxu0  ;;  %v1583_v18 = vpop.permute.xlu1 %737 }
  0xa2   : > { %v1571_v10 = vpop.f32.mrf.mxu1  ;;  %v1613_v37 = vpop.permute.xlu2 %712 }
  0xa8   : > { %v453_v12 = vpop.f32.mrf.mxu2  ;;  %v1593_v24 = vpop.permute.xlu0 %732 }
  0xa9   : > { %v515_v14 = vpop.f32.mrf.mxu3  ;;  %v1577_v15 = vpop.f32.mrf.mxu0  ;;  %v652_v57 = vmul.f32 %v1579_v16, %v453_v12 }
  0xaa   : > { %v1581_v17 = vpop.f32.mrf.mxu1  ;;  %v1595_v25 = vpop.permute.xlu1 %594 }
  0xab   : > { %v1624_v47 = vpop.permute.xlu2 %569 }
  0xb0   : > { %v456_v19 = vpop.f32.mrf.mxu2  ;;  %v1605_v31 = vpop.permute.xlu0 %589 }
  0xb1   : > { %v1585_v20 = vpop.f32.mrf.mxu3  ;;  %v1587_v21 = vpop.f32.mrf.mxu0  ;;  %v654_v51 = vmul.f32 %v1573_v11, %v456_v19 }
  0xb2   : > { %v1591_v23 = vpop.f32.mrf.mxu1  ;;  %v1607_v33 = vpop.permute.xlu1 %722 }
  0xb3   : > { %v782_v62 = vadd.f32 %v1583_v18, %v654_v51 }
  0xb5   : > { %vm814_vm6 = vcmp.ge.f32.partialorder %v782_v62, 0.0 }
  0xb8   : > { %v459_v26 = vpop.f32.mrf.mxu2  ;;  %v1615_v39 = vpop.permute.xlu0 %717 }
  0xb9   : > { %v1597_v27 = vpop.f32.mrf.mxu3  ;;  %v1599_v28 = vpop.f32.mrf.mxu0  ;;  %v656_v48 = vmul.f32 %v1561_v4, %v459_v26 }
  0xba   : > { %v1601_v29 = vpop.f32.mrf.mxu1  ;;  %v1621_v43 = vpop.permute.xlu1 %579 }
  0xbb   : > { %v784_v59 = vadd.f32 %v1565_v7, %v656_v48 }
  0xbd   : > { %vm816_vm5 = vcmp.ge.f32.partialorder %v784_v59, 0.0 }
  0xc0   : > { %v462_v32 = vpop.f32.mrf.mxu2  ;;  %v1637_v58 = vpop.permute.xlu0 %574 }
  0xc1   : > { %v524_v34 = vpop.f32.mrf.mxu3  ;;  %v1609_v35 = vpop.f32.mrf.mxu0  ;;  %v658_v45 = vmul.f32 %v1563_v6, %v462_v32  ;;  %v780_v32 = vadd.f32 %v1593_v24, %v652_v57  ;;  %v655_v57 = vmul.f32 %v1573_v11, %v1597_v27 }
  0xc2   : > { %v1611_v36 = vpop.f32.mrf.mxu1  ;;  %v1641_v63 = vpop.permute.xlu1 %707  ;;  %v657_v51 = vmul.f32 %v1561_v4, %v524_v34 }
  0xc3   : > { %v786_v54 = vadd.f32 %v1567_v8, %v658_v45  ;;  %v651_v45 = vmul.f32 %v1575_v13, %v515_v14  ;;  %v653_v14 = vmul.f32 %v1579_v16, %v1585_v20  ;;  %vm812_vm7 = vcmp.ge.f32.partialorder %v780_v32, 0.0 }
  0xc4   : > { %v785_v16 = vadd.f32 %v1565_v7, %v657_v51 }
  0xc5   : > { %v850_v26 = vmul.f32 0.01, %v786_v54  ;;  %vm818_vm4 = vcmp.ge.f32.partialorder %v786_v54, 0.0  ;;  %v781_v11 = vadd.f32 %v1593_v24, %v653_v14  ;;  %v639_v24 = vmul.f32 %v1624_v47, %v1601_v29 }
  0xc6   : > { %vm817_vm12 = vcmp.ge.f32.partialorder %v785_v16, 0.0  ;;  %v638_v29 = vmul.f32 %v1624_v47, %v1599_v28 }
  0xc7   : > { %vm813_vm13 = vcmp.ge.f32.partialorder %v781_v11, 0.0 }
  0xc8   : > { %v465_v38 = vpop.f32.mrf.mxu2  ;;  %v1661_v34 = vpop.permute.xlu0 %702 }
  0xc9   : > { %v527_v40 = vpop.f32.mrf.mxu3  ;;  %v1617_v41 = vpop.f32.mrf.mxu0  ;;  %v660_v44 = vmul.f32 %v625_v5, %v465_v38 }
  0xca   : > { %v1619_v42 = vpop.f32.mrf.mxu1  ;;  %v659_v12 = vmul.f32 %v1563_v6, %v527_v40  ;;  %v882_v40 = vsel %vm818_vm4, %v786_v54, %v850_v26  ;;  %v1666_v27 = vpop.permute.xlu1 %564  ;;  %v849_v26 = vmul.f32 0.01, %v785_v16 }
  0xcb   : > { %v788_v49 = vadd.f32 %v1555_v1, %v660_v44  ;;  %v848_v44 = vmul.f32 0.01, %v784_v59  ;;  %v643_v28 = vmul.f32 %v1621_v43, %v1619_v42 }
  0xcd   : > { %v852_v61 = vmul.f32 0.01, %v788_v49  ;;  %vm820_vm3 = vcmp.ge.f32.partialorder %v788_v49, 0.0  ;;  %v880_v4 = vsel %vm816_vm5, %v784_v59, %v848_v44 }
  0xcf   : > { %v884_v38 = vsel %vm820_vm3, %v788_v49, %v852_v61  ;;  %v844_v49 = vmul.f32 0.01, %v780_v32 }
  0xd0   : > { %v468_v46 = vpop.f32.mrf.mxu2  ;;  %v1688_v14 = vpop.permute.xlu0 %559 }
  0xd1   : > { %v662_v50 = vmul.f32 %v1557_v2, %v468_v46  ;;  %v530_v52 = vpop.f32.mrf.mxu3  ;;  %v1630_v53 = vpop.f32.mrf.mxu0  ;;  %v876_v59 = vsel %vm812_vm7, %v780_v32, %v844_v49 }
  0xd2   : > { %v1634_v56 = vpop.f32.mrf.mxu1  ;;  %v661_v0 = vmul.f32 %v625_v5, %v530_v52  ;;  %v1648_v5 = vpop.permute.xlu2 %697 }
  0xd3   : > { %v790_v55 = vadd.f32 %v1559_v3, %v662_v50  ;;  %v846_v50 = vmul.f32 0.01, %v782_v62 }
  0xd4   : > { %v789_v52 = vadd.f32 %v1555_v1, %v661_v0  ;;  %v779_v1 = vadd.f32 %v1589_v22, %v651_v45 }
  0xd5   : > { %vm822_vm2 = vcmp.ge.f32.partialorder %v790_v55, 0.0  ;;  %v854_v60 = vmul.f32 0.01, %v790_v55 }
  0xd6   : > { %v853_v54 = vmul.f32 0.01, %v789_v52  ;;  %vm821_vm9 = vcmp.ge.f32.partialorder %v789_v52, 0.0  ;;  %vm811_vm11 = vcmp.ge.f32.partialorder %v779_v1, 0.0 }
  0xd7   : > { %v886_v19 = vsel %vm822_vm2, %v790_v55, %v854_v60  ;;  %v787_v60 = vadd.f32 %v1567_v8, %v659_v12  ;;  %v843_v12 = vmul.f32 0.01, %v779_v1 }
  0xd8   : > { %902 = vmatpush.msrb.mxu2 %v886_v19  ;;  %v885_v7 = vsel %vm821_vm9, %v789_v52, %v853_v54 }
  0xd9   : > { %v533_v46 = vpop.f32.mrf.mxu3  ;;  %v1646_v48 = vpop.f32.mrf.mxu0  ;;  %v851_v0 = vmul.f32 0.01, %v787_v60  ;;  %vm819_vm10 = vcmp.ge.f32.partialorder %v787_v60, 0.0  ;;  %v875_v49 = vsel %vm811_vm11, %v779_v1, %v843_v12 }
  0xda   : > { %903 = vmatpush.msrb.mxu2 %v884_v38  ;;  %v663_v55 = vmul.f32 %v1557_v2, %v533_v46  ;;  %v509_v6 = vpop.f32.mrf.mxu1  ;;  %v878_v2 = vsel %vm814_vm6, %v782_v62, %v846_v50  ;;  %v1672_v44 = vpop.permute.xlu2 %554  ;;  %v645_v50 = vmul.f32 %v1603_v30, %v1634_v56 }
  0xdb   : > { %v647_v32 = vmul.f32 %v1605_v31, %v509_v6  ;;  %v883_v45 = vsel %vm819_vm10, %v787_v60, %v851_v0  ;;  %v1686_v6 = vadd.f32 %v1648_v5, %v639_v24  ;;  %v641_v60 = vmul.f32 %v1637_v58, %v1611_v36 }
  0xdc   : > { %904 = vmatpush.msrb.mxu2 %v882_v40  ;;  %v791_v61 = vadd.f32 %v1559_v3, %v663_v55  ;;  %v783_v3 = vadd.f32 %v1583_v18, %v655_v57  ;;  %v845_v18 = vmul.f32 0.01, %v781_v11  ;;  %v881_v55 = vsel %vm817_vm12, %v785_v16, %v849_v26 }
  0xdd   : > { %v1683_v40 = vmul.f32 %v1672_v44, %v1571_v10  ;;  %v775_v47 = vadd.f32 %v1615_v39, %v647_v32  ;;  %v640_v10 = vmul.f32 %v1637_v58, %v1609_v35  ;;  %v773_v1 = vadd.f32 %v1613_v37, %v645_v50 }
  0xde   : > { %905 = vmatpush.msrb.mxu2 %v880_v4  ;;  %vm823_vm8 = vcmp.ge.f32.partialorder %v791_v61, 0.0  ;;  %v855_v20 = vmul.f32 0.01, %v791_v61  ;;  %v847_v46 = vmul.f32 0.01, %v783_v3  ;;  %vm815_vm14 = vcmp.ge.f32.partialorder %v783_v3, 0.0 }
  0xdf   : > { %v877_v56 = vsel %vm813_vm13, %v781_v11, %v845_v18  ;;  %v644_v4 = vmul.f32 %v1603_v30, %v1630_v53  ;;  %v1711_v16 = vadd.f32 %v1661_v34, %v640_v10  ;;  %v769_v36 = vadd.f32 %v1661_v34, %v641_v60 }
  0xe0   : > { %906 = vmatpush.msrb.mxu2 %v878_v2  ;;  %v887_v8 = vsel %vm823_vm8, %v791_v61, %v855_v20  ;;  %v879_v57 = vsel %vm815_vm14, %v783_v3, %v847_v46  ;;  %v1700_v61 = vpop.permute.xlu1 %692  ;;  %v642_v30 = vmul.f32 %v1621_v43, %v1617_v41  ;;  %v771_v53 = vadd.f32 %v1641_v63, %v643_v28 }
  0xe1   : > { %925 = vmatpush.msrb.mxu3 %v887_v8  ;;  %v447_v19 = vpop.f32.mrf.mxu0  ;;  %v772_v20 = vadd.f32 %v1613_v37, %v644_v4  ;;  %vm807_vm0 = vcmp.ge.f32.partialorder %v775_v47, 0.0  ;;  %v837_v34 = vmul.f32 0.01, %v773_v1  ;;  %vm799_vm1 = vcmp.ge.f32.partialorder %v1686_v6, 0.0  ;;  %v688_v8 = vpop.permute.xlu0 %687 }
  0xe2   : > { %907 = vmatpush.msrb.mxu2 %v876_v59  ;;  %v512_v62 = vpop.f32.mrf.mxu1  ;;  %v648_v51 = vmul.f32 %v1595_v25, %v447_v19  ;;  %v770_v11 = vadd.f32 %v1641_v63, %v642_v30  ;;  %vm805_vm3 = vcmp.ge.f32.partialorder %v773_v1, 0.0  ;;  %vm801_vm5 = vcmp.ge.f32.partialorder %v769_v36, 0.0 }
  0xe3   : > { %v649_v38 = vmul.f32 %v1595_v25, %v512_v62  ;;  %926 = vmatpush.msrb.mxu3 %v885_v7  ;;  %v646_v25 = vmul.f32 %v1605_v31, %v1646_v48  ;;  %v1706_v31 = vadd.f32 %v1648_v5, %v638_v29  ;;  %v635_v37 = vmul.f32 %v1688_v14, %v1581_v17 }
  0xe4   : > { %v776_v48 = vadd.f32 %v1607_v33, %v648_v51  ;;  %vm803_vm6 = vcmp.ge.f32.partialorder %v771_v53, 0.0  ;;  %v833_v59 = vmul.f32 0.01, %v769_v36  ;;  %v869_v63 = vsel %vm805_vm3, %v773_v1, %v837_v34 }
  0xe5   : > { %927 = vmatpush.msrb.mxu3 %v883_v45  ;;  %v777_v52 = vadd.f32 %v1607_v33, %v649_v38  ;;  %v774_v58 = vadd.f32 %v1615_v39, %v646_v25  ;;  %v839_v33 = vmul.f32 0.01, %v775_v47  ;;  %v836_v62 = vmul.f32 0.01, %v772_v20 }
  0xe6   : > { %v840_v54 = vmul.f32 0.01, %v776_v48  ;;  %vm808_vm4 = vcmp.ge.f32.partialorder %v776_v48, 0.0  ;;  %v636_v7 = vmul.f32 %v1666_v27, %v1587_v21  ;;  %vm804_vm8 = vcmp.ge.f32.partialorder %v772_v20, 0.0 }
  0xe7   : > { %928 = vmatpush.msrb.mxu3 %v881_v55  ;;  %v841_v35 = vmul.f32 0.01, %v777_v52  ;;  %vm809_vm15 = vcmp.ge.f32.partialorder %v777_v52, 0.0  ;;  %v838_v3 = vmul.f32 0.01, %v774_v58  ;;  %vm806_vm7 = vcmp.ge.f32.partialorder %v774_v58, 0.0 }
  0xe8   : > { %v872_v19 = vsel %vm808_vm4, %v776_v48, %v840_v54  ;;  %v683_v26 = vpop.permute.xlu1 %682  ;;  %v831_v17 = vmul.f32 0.01, %v1686_v6  ;;  %vm800_vm9 = vcmp.ge.f32.partialorder %v1711_v16, 0.0  ;;  %v763_v12 = vadd.f32 %v688_v8, %v635_v37  ;;  %v895_v48 = vpop.permute.xlu2 %894 }
  0xe9   : > { %929 = vmatpush.msrb.mxu3 %v879_v57  ;;  %v450_v42 = vpop.f32.mrf.mxu0  ;;  %v873_v41 = vsel %vm809_vm15, %v777_v52, %v841_v35  ;;  %v870_v38 = vsel %vm806_vm7, %v774_v58, %v838_v3  ;;  %v834_v18 = vmul.f32 0.01, %v770_v11  ;;  %v634_v32 = vmul.f32 %v1688_v14, %v1577_v15  ;;  %v888_v57 = vld [vmem:[%s1794_s4] sm:$0xff] }
  0xea   : > { %v650_v2 = vmul.f32 %v1575_v13, %v450_v42  ;;  %v637_v13 = vmul.f32 %v1666_v27, %v1591_v23  ;;  %v835_v23 = vmul.f32 0.01, %v771_v53  ;;  %v865_v45 = vsel %vm801_vm5, %v769_v36, %v833_v59  ;;  %v889_v42 = vld [vmem:[%s1794_s4 + $0x8] sm:$0xff] }
  0xeb   : > { %930 = vmatpush.msrb.mxu3 %v877_v56  ;;  %vm802_vm10 = vcmp.ge.f32.partialorder %v770_v11, 0.0  ;;  %v832_v21 = vmul.f32 0.01, %v1711_v16  ;;  %v764_v27 = vadd.f32 %v1700_v61, %v636_v7  ;;  %v761_v46 = vadd.f32 %v683_v26, %v1683_v40 }
  0xec   : > { %v778_v5 = vadd.f32 %v1589_v22, %v650_v2  ;;  %v871_v22 = vsel %vm807_vm0, %v775_v47, %v839_v33  ;;  %v765_v0 = vadd.f32 %v1700_v61, %v637_v13  ;;  %v867_v24 = vsel %vm803_vm6, %v771_v53, %v835_v23 }
  0xed   : > { %931 = vmatpush.msrb.mxu3 %v875_v49  ;;  %v868_v50 = vsel %vm804_vm8, %v772_v20, %v836_v62  ;;  %v632_v51 = vmul.f32 %v1672_v44, %v1569_v9  ;;  %v830_v15 = vmul.f32 0.01, %v1706_v31  ;;  %v762_v52 = vadd.f32 %v688_v8, %v634_v32 }
  0xee   : > { %vm810_vm2 = vcmp.ge.f32.partialorder %v778_v5, 0.0  ;;  %v842_v43 = vmul.f32 0.01, %v778_v5  ;;  %v829_v29 = vmul.f32 0.01, %v765_v0  ;;  %vm797_vm11 = vcmp.ge.f32.partialorder %v765_v0, 0.0 }
  0xef   : > { %932 = vmatpush.msrb.mxu3 %v873_v41  ;;  %v863_v55 = vsel %vm799_vm1, %v1686_v6, %v831_v17  ;;  %v866_v14 = vsel %vm802_vm10, %v770_v11, %v834_v18  ;;  %v827_v56 = vmul.f32 0.01, %v763_v12  ;;  %v864_v40 = vsel %vm800_vm9, %v1711_v16, %v832_v21 }
  0xf0   : > { %v874_v39 = vsel %vm810_vm2, %v778_v5, %v842_v43  ;;  %vm795_vm12 = vcmp.ge.f32.partialorder %v763_v12, 0.0  ;;  %vm798_vm13 = vcmp.ge.f32.partialorder %v1706_v31, 0.0  ;;  %v760_v9 = vadd.f32 %v683_v26, %v632_v51  ;;  %v953_v16 = vpop.permute.xlu1 %952  ;;  %v958_v54 = vpop.permute.xlu2 %957 }
  0xf1   : > { %933 = vmatpush.msrb.mxu3 %v871_v22  ;;  %908 = vmatpush.msrb.mxu2 %v874_v39  ;;  %v861_v44 = vsel %vm797_vm11, %v765_v0, %v829_v29  ;;  %v825_v49 = vmul.f32 0.01, %v761_v46  ;;  %v828_v28 = vmul.f32 0.01, %v764_v27  ;;  %vm793_vm14 = vcmp.ge.f32.partialorder %v761_v46, 0.0 }
  0xf2   : > { %vm796_vm15 = vcmp.ge.f32.partialorder %v764_v27, 0.0  ;;  %v859_v6 = vsel %vm795_vm12, %v763_v12, %v827_v56  ;;  %v862_v25 = vsel %vm798_vm13, %v1706_v31, %v830_v15  ;;  %v826_v47 = vmul.f32 0.01, %v762_v52  ;;  %v900_v31 = vpop.permute.xlu0 %899 }
  0xf3   : > { %934 = vmatpush.msrb.mxu3 %v869_v63  ;;  %909 = vmatpush.msrb.mxu2 %v872_v19  ;;  %vm794_vm0 = vcmp.ge.f32.partialorder %v762_v52, 0.0  ;;  %v857_v10 = vsel %vm793_vm14, %v761_v46, %v825_v49  ;;  %v860_v60 = vsel %vm796_vm15, %v764_v27, %v828_v28  ;;  %v824_v61 = vmul.f32 0.01, %v760_v9 }
  0xf4   : > { %vm792_vm1 = vcmp.ge.f32.partialorder %v760_v9, 0.0  ;;  %v858_v4 = vsel %vm794_vm0, %v762_v52, %v826_v47 }
  0xf5   : > { %935 = vmatpush.msrb.mxu3 %v867_v24  ;;  %910 = vmatpush.msrb.mxu2 %v870_v38  ;;  %v856_v1 = vsel %vm792_vm1, %v760_v9, %v824_v61 }
  0xf7   : > { %936 = vmatpush.msrb.mxu3 %v865_v45  ;;  %911 = vmatpush.msrb.mxu2 %v868_v50 }
  0xf8   : > { %v974_v39 = vpop.permute.xlu1 %973 }
  0xf9   : > { %937 = vmatpush.msrb.mxu3 %v863_v55  ;;  %912 = vmatpush.msrb.mxu2 %v866_v14 }
  0xfa   : > { %v969_v30 = vpop.permute.xlu0 %968 }
  0xfb   : > { %938 = vmatpush.msrb.mxu3 %v861_v44  ;;  %913 = vmatpush.msrb.mxu2 %v864_v40 }
  0xfd   : > { %939 = vmatpush.msrb.mxu3 %v859_v6  ;;  %914 = vmatpush.msrb.mxu2 %v862_v25 }
  0xff   : > { %940 = vmatpush.msrb.mxu3 %v857_v10  ;;  %915 = vmatpush.msrb.mxu2 %v860_v60 }
 0x100   : > { %941 = vmatmul.f32.vlgmr.msrb.gmra.mxu3 %v888_v57 }
 0x101   : > { %916 = vmatpush.msrb.mxu2 %v858_v4 }
 0x103   : > { %917 = vmatpush.msrb.mxu2 %v856_v1 }
 0x104   : > { %918 = vmatmul.f32.vlgmr.msrb.gmra.mxu2 %v888_v57 }
 0x108   : > { %944 = vmatmul.f32.gmra.mxu3 %v889_v42 }
 0x10c   : > { %921 = vmatmul.f32.gmra.mxu2 %v889_v42 }
 0x183   : > { %v942_v2 = vpop.f32.mrf.mxu3 }
 0x184   : > { %v943_v35 = vadd.f32 %v942_v2, %v895_v48 }
 0x186   : > { %v961_v36 = vmul.f32 %v953_v16, %v943_v35 }
 0x187   : > { %v919_v53 = vpop.f32.mrf.mxu2 }
 0x188   : > { %v977_v58 = vadd.f32 %v969_v30, %v961_v36  ;;  %v920_v5 = vadd.f32 %v919_v53, %v895_v48 }
 0x18a   : > { %vm981_vm2 = vcmp.ge.f32.partialorder %v977_v58, 0.0  ;;  %v985_v33 = vmul.f32 0.01, %v977_v58  ;;  %v960_v13 = vmul.f32 %v953_v16, %v920_v5 }
 0x18b   : > { %v945_v20 = vpop.f32.mrf.mxu3 }
 0x18c   : > { %v989_v34 = vsel %vm981_vm2, %v977_v58, %v985_v33  ;;  %v976_v41 = vadd.f32 %v969_v30, %v960_v13  ;;  %v946_v43 = vadd.f32 %v945_v20, %v900_v31 }
 0x18d   : > { %993 = vst [vmem:[%s313_s26 + $0x8] sm:$0xff] %v989_v34 }
 0x18e   : > { %vm980_vm3 = vcmp.ge.f32.partialorder %v976_v41, 0.0  ;;  %v984_v11 = vmul.f32 0.01, %v976_v41  ;;  %v963_v22 = vmul.f32 %v958_v54, %v946_v43 }
 0x18f   : > { %v922_v23 = vpop.f32.mrf.mxu2 }
 0x190   : > { %v988_v3 = vsel %vm980_vm3, %v976_v41, %v984_v11  ;;  %v979_v37 = vadd.f32 %v974_v39, %v963_v22  ;;  %v923_v8 = vadd.f32 %v922_v23, %v900_v31 }
 0x191   : > { %992 = vst [vmem:[%s313_s26] sm:$0xff] %v988_v3 }
 0x192   : > { %vm983_vm4 = vcmp.ge.f32.partialorder %v979_v37, 0.0  ;;  %v987_v59 = vmul.f32 0.01, %v979_v37  ;;  %v962_v0 = vmul.f32 %v958_v54, %v923_v8 }
 0x194   : > { %v991_v63 = vsel %vm983_vm4, %v979_v37, %v987_v59  ;;  %v978_v19 = vadd.f32 %v974_v39, %v962_v0 }
 0x195   : > { %995 = vst [vmem:[%s313_s26 + $0x18] sm:$0xff] %v991_v63 }
 0x196   : > { %vm982_vm5 = vcmp.ge.f32.partialorder %v978_v19, 0.0  ;;  %v986_v62 = vmul.f32 0.01, %v978_v19 }
 0x198   : > { %v990_v7 = vsel %vm982_vm5, %v978_v19, %v986_v62 }
 0x199   : > { %994 = vst [vmem:[%s313_s26 + $0x10] sm:$0xff] %v990_v7 }
 0x19a   : > { %1218 = shalt.err (!%p1215_p3)
}
 0x19b   : > { %s1256_s25 = smov 256   ;;  %s1257_s26 = smov 16  }
 0x19c   : > { %1146 = dma.vmem_to_hbm [thread:$0]  (%p1341_p5), %s1010_s18, 512, %s1012_s19, %s997_s9, %s1256_s25, %s1256_s25, %s1257_s26  }
 0x19d PF: > { %p1152_p4 = scmp.ge.s32.totalorder %s1253_s30, 2  ;;  %s1026_s13 = sand.u32 1, %s1241_s27  }
 0x19e   : > { %s1027_s17 = scalar_lea.sflag [#allocation3], %s1026_s13 }
 0x19f   : > { %p1149_p7 = pnand %p1152_p4, %p1345_p6 }
 0x1a1   : > { %p1150_p8 = pneg %p1149_p7 }
 0x1a3   : > { %1236 = dma.done.wait (%p1150_p8), %s1027_s17, 512  }
 0x1a4   : > { %1238 = vsyncadd (%p1150_p8), %s1027_s17, 4294966784  ;;  %p18_p9 = scmp.ge.s32.totalorder %s1328_s11, 4   ;;  %s1801_s27 = smov %s1245_s28 }
 0x1a5   : > { %s1802_s28 = smov %s1249_s29  ;;  %s1803_s29 = smov %s1339_s14 }
 0x1a6   : > { %s1804_s30 = smov %s1328_s11  ;;  %20 = sbr.rel (!%p18_p9) target bundleno = 3 (0x3), region = 90 }
 0x1ab   :  { %1033 = vsyncpa [#allocation3], 1 }
 0x1ac   :  { %1035 = vsyncpa [#allocation3 + $0x1], 1 }

</bundles_post_ra>
